<compile_context>
chip_gen: v5e
topology: v5e:2x2
jax: 0.10.0
libtpu: 0.0.40
codegen_flags: <defaults>
</compile_context>

<pallas_src>
import jax
import jax.numpy as jnp
from jax import lax
from jax.experimental import pallas as pl
from jax.experimental.pallas import tpu as pltpu


def _round_up(x, m):
    return ((x + m - 1) // m) * m


def _complex_conv_matmul_kernel(x_ref, w_ref, b_ref, o_ref):
    """One M-tile per grid step.

    x_ref : (TM, K_pad)     im2col'd [x_real | x_imag] patch rows (K zero-padded to 128)
    w_ref : (K_pad, N_pad)  block-structured complex weight (rows/cols zero-padded)
    b_ref : (1, N_pad)      precombined biases [b_r - b_i | b_r + b_i] (lane-padded)
    o_ref : (TM, N_pad)     fused [out_real | out_imag] rows
    """
    o_ref[...] = (
        jnp.dot(x_ref[...], w_ref[...], preferred_element_type=jnp.float32)
        + b_ref[...]
    ).astype(o_ref.dtype)


def _num_m_splits():
    """Grid steps along M: 2 on v7x (2 TensorCores/chip), 1 on single-core chips."""
    try:
        kind = jax.devices()[0].device_kind.lower()
    except Exception:
        return 1
    return 2 if "v7" in kind else 1


def complex_conv2d(x, w_real, w_imag, b_real, b_imag, use_bf16=False):
    """x: [N, C_in, H, W, 2] (PyTorch NCHW + trailing real/imag dim).

    w_real / w_imag: [C_out, C_in, KH, KW] (PyTorch OIHW)
    b_real / b_imag: [C_out]
    Returns: [N, C_out, H_out, W_out, 2]
    """
    n, c_in, h, w_sp, _ = x.shape
    c_out, _, kh, kw = w_real.shape
    h_out = h - kh + 1
    w_out = w_sp - kw + 1

    # ---- Layout glue (one transpose in) ------------------------------------------------
    # (N, C_in, H, W, 2) -> (N, H, W, 2, C_in) -> (N, H, W, 2*C_in) = [x_real | x_imag].
    x_cat = jnp.transpose(x, (0, 2, 3, 4, 1)).reshape(n, h, w_sp, 2 * c_in)
    x_cat = x_cat.astype(jnp.float32)

    # im2col in the wrapper: (N, H_out, W_out, KH*KW, 2*C_in) -> (M, K_dim).
    # TODO(synk): building these patch rows inside the kernel from one resident
    # (N,H,W,2*C_in) VMEM block would avoid the x_cols HBM round-trip; kept in the
    # wrapper because the ragged, non-(8,128)-aligned slices/reshapes are fragile to
    # lower in-kernel at these shapes.
    patches = [x_cat[:, i:i + h_out, j:j + w_out, :]
               for i in range(kh) for j in range(kw)]
    x_cols = jnp.stack(patches, axis=3).reshape(n * h_out * w_out, kh * kw * 2 * c_in)

    # Block-structured complex weight: rows = [real-input | imag-input] channels,
    # cols = [real-output | imag-output] channels.
    wr = jnp.transpose(w_real, (2, 3, 1, 0)).astype(jnp.float32)  # (KH, KW, C_in, C_out)
    wi = jnp.transpose(w_imag, (2, 3, 1, 0)).astype(jnp.float32)
    w_top = jnp.concatenate([wr, wi], axis=-1)       # x_real rows -> [ w_r | w_i]
    w_bot = jnp.concatenate([-wi, wr], axis=-1)      # x_imag rows -> [-w_i | w_r]
    w_cat = jnp.concatenate([w_top, w_bot], axis=2)  # (KH, KW, 2*C_in, 2*C_out)
    w_cat = w_cat.reshape(kh * kw * 2 * c_in, 2 * c_out)

    # Precombined biases matching the fused [out_real | out_imag] columns.
    b_cat = jnp.concatenate([b_real - b_imag, b_real + b_imag]).astype(jnp.float32)

    # ---- Padding to TPU-friendly tiles -------------------------------------------------
    m_total = n * h_out * w_out
    k_dim = kh * kw * 2 * c_in
    n_dim = 2 * c_out

    LANE = 128
    SUB = 8
    k_pad = _round_up(k_dim, LANE)   # lane-dense contraction; zeros on both operands
    n_pad = _round_up(n_dim, LANE)   # lane-dense output channels -> unmasked stores

    # Minimal grid: 1 step on v5e/v6e, 2 balanced steps on v7x.  TM capped as a VMEM
    # guard (double-buffered (TM,k_pad)+(TM,n_pad) f32 blocks must stay well inside the
    # scoped VMEM limit, esp. on v7x's 64 MiB).
    n_splits = _num_m_splits()
    tm = _round_up(max(1, -(-m_total // n_splits)), SUB)
    tm = min(tm, 512)
    grid_m = -(-m_total // tm)
    m_pad = grid_m * tm

    x_cols = jnp.pad(x_cols, ((0, m_pad - m_total), (0, k_pad - k_dim)))
    w_pad = jnp.pad(w_cat, ((0, k_pad - k_dim), (0, n_pad - n_dim)))
    b_pad = jnp.pad(b_cat, (0, n_pad - n_dim)).reshape(1, n_pad)

    if use_bf16:
        # bf16 operands, f32 accumulation (native MXU rate on all generations).
        # Off by default: violates the 1e-4 tolerance used below.
        x_cols = x_cols.astype(jnp.bfloat16)
        w_pad = w_pad.astype(jnp.bfloat16)

    cost = pl.CostEstimate(
        flops=2 * m_pad * k_pad * n_pad,
        transcendentals=0,
        bytes_accessed=4 * (m_pad * k_pad + k_pad * n_pad + n_pad + m_pad * n_pad),
    )

    out = pl.pallas_call(
        _complex_conv_matmul_kernel,
        out_shape=jax.ShapeDtypeStruct((m_pad, n_pad), jnp.float32),
        grid_spec=pltpu.PrefetchScalarGridSpec(
            num_scalar_prefetch=0,
            grid=(grid_m,),
            in_specs=[
                pl.BlockSpec((tm, k_pad), lambda m: (m, 0)),
                pl.BlockSpec((k_pad, n_pad), lambda m: (0, 0)),
                pl.BlockSpec((1, n_pad), lambda m: (0, 0)),
            ],
            out_specs=pl.BlockSpec((tm, n_pad), lambda m: (m, 0)),
        ),
        compiler_params=pltpu.CompilerParams(
            dimension_semantics=("parallel",),
        ),
        cost_estimate=cost,
    )(x_cols, w_pad, b_pad)

    # ---- Layout glue (one transpose out, no stack) -------------------------------------
    # (M, 2*C_out) -> (N, H_out, W_out, 2, C_out) -> (N, C_out, H_out, W_out, 2)
    out = out[:m_total, :n_dim].reshape(n, h_out, w_out, 2, c_out)
    return jnp.transpose(out, (0, 4, 1, 2, 3))


# ------------------------------- reference ----------------------------------------------
def _conv2d_ref(x_nchw, w_oihw, b):
    out = lax.conv_general_dilated(
        x_nchw, w_oihw, window_strides=(1, 1), padding="VALID",
        dimension_numbers=("NCHW", "OIHW", "NCHW"))
    return out + b[None, :, None, None]


def _complex_conv_ref(x, w_real, w_imag, b_real, b_imag):
    xr = x[..., 0]
    xi = x[..., 1]
    out_real = _conv2d_ref(xr, w_real, b_real) - _conv2d_ref(xi, w_imag, b_imag)
    out_imag = _conv2d_ref(xi, w_real, b_real) + _conv2d_ref(xr, w_imag, b_imag)
    return jnp.stack([out_real, out_imag], axis=-1)


if __name__ == "__main__":
    # Module config: rank=2, in_channels=4, out_channels=8, kernel_size=3, bias=True.
    # TODO(synk): only the rank=2, non-transposed, stride=1/padding=0/dilation=1/groups=1
    # configuration is implemented (matches this module instantiation).
    N, C_IN, C_OUT, H, W, K = 2, 4, 8, 16, 16, 3

    key = jax.random.PRNGKey(0)
    k_x, k_wr, k_wi, k_br, k_bi = jax.random.split(key, 5)

    # Input: [N, C_in, H, W, 2] — last dim holds (real, imag), as in ComplexConv.forward.
    x = jax.random.normal(k_x, (N, C_IN, H, W, 2), dtype=jnp.float32)

    # Deterministic synthetic parameters (shapes follow nn.Conv2d inside the module).
    w_real = jax.random.normal(k_wr, (C_OUT, C_IN, K, K), dtype=jnp.float32) * 0.1
    w_imag = jax.random.normal(k_wi, (C_OUT, C_IN, K, K), dtype=jnp.float32) * 0.1
    b_real = jax.random.normal(k_br, (C_OUT,), dtype=jnp.float32) * 0.1
    b_imag = jax.random.normal(k_bi, (C_OUT,), dtype=jnp.float32) * 0.1

    out = complex_conv2d(x, w_real, w_imag, b_real, b_imag)
    out = jax.block_until_ready(out)

    ref = _complex_conv_ref(x, w_real, w_imag, b_real, b_imag)
    ref = jax.block_until_ready(ref)

    assert out.shape == (N, C_OUT, H - K + 1, W - K + 1, 2), out.shape
    assert jnp.allclose(out, ref, atol=1e-4, rtol=1e-4), float(jnp.max(jnp.abs(out - ref)))

    print("KERNEL_OK")
</pallas_src>

<mosaic_0001>
module attributes {stable_mosaic.version = 11 : i64} {
  func.func @_complex_conv_matmul_kernel(%arg0: i32, %arg1: memref<392x128xf32, #tpu.memory_space<vmem>>, %arg2: memref<128x128xf32, #tpu.memory_space<vmem>>, %arg3: memref<1x128xf32, #tpu.memory_space<vmem>>, %arg4: memref<392x128xf32, #tpu.memory_space<vmem>>) attributes {dimension_semantics = [#tpu.dimension_semantics<parallel>], iteration_bounds = array<i64: 1>, scalar_prefetch = 0 : i64, scratch_operands = 0 : i64, tpu.core_type = #tpu.core_type<tc>, window_params = [{transform_indices = @transform_0, window_bounds = array<i64: 392, 128>}, {pipeline_mode = #tpu.pipeline_mode<synchronous>, transform_indices = @transform_1, window_bounds = array<i64: 128, 128>}, {pipeline_mode = #tpu.pipeline_mode<synchronous>, transform_indices = @transform_2, window_bounds = array<i64: 1, 128>}, {transform_indices = @transform_3, window_bounds = array<i64: 392, 128>}]} {
    %c0 = arith.constant 0 : index
    %c0_0 = arith.constant 0 : index
    %0 = vector.load %arg1[%c0, %c0_0] : memref<392x128xf32, #tpu.memory_space<vmem>>, vector<392x128xf32>
    %c0_1 = arith.constant 0 : index
    %c0_2 = arith.constant 0 : index
    %1 = vector.load %arg2[%c0_1, %c0_2] : memref<128x128xf32, #tpu.memory_space<vmem>>, vector<128x128xf32>
    %cst = arith.constant dense<0.000000e+00> : vector<392x128xf32>
    %2 = tpu.matmul %0, %1, %cst {dimension_numbers = #tpu.dot_dimension_numbers<[1], [0], [0], [1], [0, 0, 1, 1], [], []>} : vector<392x128xf32>, vector<128x128xf32>, vector<392x128xf32> -> vector<392x128xf32>
    %c0_3 = arith.constant 0 : index
    %c0_4 = arith.constant 0 : index
    %3 = vector.load %arg3[%c0_3, %c0_4] : memref<1x128xf32, #tpu.memory_space<vmem>>, vector<1x128xf32>
    %4 = vector.broadcast %3 : vector<1x128xf32> to vector<392x128xf32>
    %5 = arith.addf %2, %4 : vector<392x128xf32>
    %c0_5 = arith.constant 0 : index
    %c0_6 = arith.constant 0 : index
    %6 = vector.load %arg4[%c0_5, %c0_6] : memref<392x128xf32, #tpu.memory_space<vmem>>, vector<392x128xf32>
    tpu.vector_store %arg4[%c0_5, %c0_6], %5 {strides = array<i32>} : memref<392x128xf32, #tpu.memory_space<vmem>>, vector<392x128xf32>,
    return
  }
  func.func @transform_0(%arg0: i32) -> (i32, i32) {
    %c0_i32 = arith.constant 0 : i32
    %c0_i32_0 = arith.constant 0 : i32
    return %arg0, %c0_i32 : i32, i32
  }
  func.func @transform_1(%arg0: i32) -> (i32, i32) {
    %c0_i32 = arith.constant 0 : i32
    %c0_i32_0 = arith.constant 0 : i32
    %c0_i32_1 = arith.constant 0 : i32
    return %c0_i32, %c0_i32_0 : i32, i32
  }
  func.func @transform_2(%arg0: i32) -> (i32, i32) {
    %c0_i32 = arith.constant 0 : i32
    %c0_i32_0 = arith.constant 0 : i32
    %c0_i32_1 = arith.constant 0 : i32
    return %c0_i32, %c0_i32_0 : i32, i32
  }
  func.func @transform_3(%arg0: i32) -> (i32, i32) {
    %c0_i32 = arith.constant 0 : i32
    %c0_i32_0 = arith.constant 0 : i32
    return %arg0, %c0_i32 : i32, i32
  }
}

</mosaic_0001>

<bundles_post_ra>
// kernel: tpu_custom_call.1
= control target key start
LH: loop header
LB: loop body
LE: loop exit
PB: predicated region body
PF: predicated region fallthrough
CT: control target
= control target key end

     0   :  { %8 = vsyncpa [#allocation3], 0  ;;  %s578_s0 = inlined_call_operand.hbm [shape: f32[392,128], index: 0, kind: input, shape index: {}]   ;;  %s579_s1 = inlined_call_operand.hbm [shape: f32[128,128], index: 1, kind: input, shape index: {}]   ;;  %s580_s2 = inlined_call_operand.vmem [shape: f32[1,128], index: 2, kind: input, shape index: {}]   ;;  %s581_s3 = inlined_call_operand.hbm [shape: f32[392,128], index: 3, kind: output, shape index: {}]  }
   0x1   :  { %9 = vsyncpa [#allocation6], 0 }
   0x2   :  { %10 = vsyncpa [#allocation4], 0  ;;  %s15_s14 = sshll.u32 %s578_s0, 4  ;;  %s481_s15 = smov [#allocation2]   ;;  %s16_s14 = int_to_ptr.hbm [resolvable:$true] %s15_s14 }
   0x3   :  { %s17_s16 = sshll.u32 %s481_s15, 4  ;;  %s28_s19 = sshll.u32 %s579_s1, 4  ;;  %s18_s16 = int_to_ptr.vmem [resolvable:$true] %s17_s16  ;;  %s29_s19 = int_to_ptr.hbm [resolvable:$true] %s28_s19 }
   0x4   :  { %s482_s20 = smov 128   ;;  %s483_s21 = smov 8  }
   0x5   :  { %23 = dma.hbm_to_vmem [thread:$0]  %s16_s14, 6272, %s18_s16, [#allocation3], %s482_s20, %s482_s20, %s483_s21  }
   0x6   :  { %s484_s22 = smov [#allocation5]  }
   0x7   :  { %s30_s23 = sshll.u32 %s484_s22, 4  ;;  %s31_s23 = int_to_ptr.vmem [resolvable:$true] %s30_s23 }
   0x8   :  { %36 = dma.hbm_to_vmem [thread:$0]  %s29_s19, 2048, %s31_s23, [#allocation6], %s482_s20, %s482_s20, %s483_s21  }
   0x9   :  { %475 = dma.done.wait [#allocation3], 6272  }
   0xa   :  { %476 = vsyncadd [#allocation3], 4294961024 }
   0xb   :  { %477 = dma.done.wait [#allocation6], 2048  }
   0xc   :  { %478 = vsyncadd [#allocation6], 4294965248  ;;  %v111_v0 = vld [vmem:[#allocation5 + $0x78] sm:$0xff]  ;;  %v110_v1 = vld [vmem:[#allocation5 + $0x70] sm:$0xff]  ;;  %s335_s27 = sshll.u32 %s581_s3, 4  ;;  %s336_s27 = int_to_ptr.hbm [resolvable:$true] %s335_s27 }
   0xd   :  { %350 = vmatpush.msra.mxu2 %v111_v0  ;;  %351 = vmatpush.msra.mxu3 %v111_v0  ;;  %v109_v2 = vld [vmem:[#allocation5 + $0x68] sm:$0xff]  ;;  %v108_v3 = vld [vmem:[#allocation5 + $0x60] sm:$0xff]  ;;  %v107_v4 = vld [vmem:[#allocation5 + $0x58] sm:$0xff] }
   0xe   :  { %349 = vmatpush.msra.mxu1 %v111_v0  ;;  %116 = vmatpush.msra.mxu0 %v111_v0  ;;  %v106_v5 = vld [vmem:[#allocation5 + $0x50] sm:$0xff]  ;;  %v105_v6 = vld [vmem:[#allocation5 + $0x48] sm:$0xff]  ;;  %v104_v7 = vld [vmem:[#allocation5 + $0x40] sm:$0xff] }
   0xf   :  { %353 = vmatpush.msra.mxu2 %v110_v1  ;;  %354 = vmatpush.msra.mxu3 %v110_v1  ;;  %v103_v8 = vld [vmem:[#allocation5 + $0x38] sm:$0xff]  ;;  %v102_v9 = vld [vmem:[#allocation5 + $0x30] sm:$0xff]  ;;  %v101_v10 = vld [vmem:[#allocation5 + $0x28] sm:$0xff] }
  0x10   :  { %352 = vmatpush.msra.mxu1 %v110_v1  ;;  %117 = vmatpush.msra.mxu0 %v110_v1  ;;  %v100_v11 = vld [vmem:[#allocation5 + $0x20] sm:$0xff]  ;;  %v99_v12 = vld [vmem:[#allocation5 + $0x18] sm:$0xff]  ;;  %v98_v13 = vld [vmem:[#allocation5 + $0x10] sm:$0xff] }
  0x11   :  { %356 = vmatpush.msra.mxu2 %v109_v2  ;;  %357 = vmatpush.msra.mxu3 %v109_v2  ;;  %v97_v14 = vld [vmem:[#allocation5 + $0x8] sm:$0xff]  ;;  %v96_v15 = vld [vmem:[#allocation5] sm:$0xff]  ;;  %v70_v16 = vld [vmem:[#allocation2 + $0xb8] sm:$0xff] }
  0x12   :  { %355 = vmatpush.msra.mxu1 %v109_v2  ;;  %118 = vmatpush.msra.mxu0 %v109_v2  ;;  %v83_v17 = vld [vmem:[#allocation2 + $0x120] sm:$0xff]  ;;  %v58_v18 = vld [vmem:[#allocation2 + $0x58] sm:$0xff]  ;;  %v84_v21 = vld [vmem:[#allocation2 + $0x128] sm:$0xff] }
  0x13   :  { %359 = vmatpush.msra.mxu2 %v108_v3  ;;  %360 = vmatpush.msra.mxu3 %v108_v3  ;;  %v47_v19 = vld [vmem:[#allocation2] sm:$0xff]  ;;  %v48_v23 = vld [vmem:[#allocation2 + $0x8] sm:$0xff]  ;;  %v85_v25 = vld [vmem:[#allocation2 + $0x130] sm:$0xff] }
  0x14   :  { %358 = vmatpush.msra.mxu1 %v108_v3  ;;  %119 = vmatpush.msra.mxu0 %v108_v3  ;;  %v71_v20 = vld [vmem:[#allocation2 + $0xc0] sm:$0xff]  ;;  %v72_v24 = vld [vmem:[#allocation2 + $0xc8] sm:$0xff]  ;;  %v49_v27 = vld [vmem:[#allocation2 + $0x10] sm:$0xff] }
  0x15   :  { %362 = vmatpush.msra.mxu2 %v107_v4  ;;  %363 = vmatpush.msra.mxu3 %v107_v4  ;;  %v59_v22 = vld [vmem:[#allocation2 + $0x60] sm:$0xff]  ;;  %v60_v26 = vld [vmem:[#allocation2 + $0x68] sm:$0xff]  ;;  %v73_v28 = vld [vmem:[#allocation2 + $0xd0] sm:$0xff] }
  0x16   :  { %361 = vmatpush.msra.mxu1 %v107_v4  ;;  %120 = vmatpush.msra.mxu0 %v107_v4  ;;  %v86_v29 = vld [vmem:[#allocation2 + $0x138] sm:$0xff]  ;;  %v61_v30 = vld [vmem:[#allocation2 + $0x70] sm:$0xff]  ;;  %v87_v33 = vld [vmem:[#allocation2 + $0x140] sm:$0xff] }
  0x17   :  { %365 = vmatpush.msra.mxu2 %v106_v5  ;;  %366 = vmatpush.msra.mxu3 %v106_v5  ;;  %v50_v31 = vld [vmem:[#allocation2 + $0x18] sm:$0xff]  ;;  %v51_v35 = vld [vmem:[#allocation2 + $0x20] sm:$0xff]  ;;  %v88_v37 = vld [vmem:[#allocation2 + $0x148] sm:$0xff] }
  0x18   :  { %364 = vmatpush.msra.mxu1 %v106_v5  ;;  %121 = vmatpush.msra.mxu0 %v106_v5  ;;  %v74_v32 = vld [vmem:[#allocation2 + $0xd8] sm:$0xff]  ;;  %v75_v36 = vld [vmem:[#allocation2 + $0xe0] sm:$0xff]  ;;  %v52_v39 = vld [vmem:[#allocation2 + $0x28] sm:$0xff] }
  0x19   :  { %368 = vmatpush.msra.mxu2 %v105_v6  ;;  %369 = vmatpush.msra.mxu3 %v105_v6  ;;  %v62_v34 = vld [vmem:[#allocation2 + $0x78] sm:$0xff]  ;;  %v63_v38 = vld [vmem:[#allocation2 + $0x80] sm:$0xff]  ;;  %v76_v40 = vld [vmem:[#allocation2 + $0xe8] sm:$0xff] }
  0x1a   :  { %367 = vmatpush.msra.mxu1 %v105_v6  ;;  %122 = vmatpush.msra.mxu0 %v105_v6  ;;  %v89_v41 = vld [vmem:[#allocation2 + $0x150] sm:$0xff]  ;;  %v64_v42 = vld [vmem:[#allocation2 + $0x88] sm:$0xff]  ;;  %v90_v45 = vld [vmem:[#allocation2 + $0x158] sm:$0xff] }
  0x1b   :  { %371 = vmatpush.msra.mxu2 %v104_v7  ;;  %372 = vmatpush.msra.mxu3 %v104_v7  ;;  %v53_v43 = vld [vmem:[#allocation2 + $0x30] sm:$0xff]  ;;  %v54_v47 = vld [vmem:[#allocation2 + $0x38] sm:$0xff]  ;;  %v91_v49 = vld [vmem:[#allocation2 + $0x160] sm:$0xff] }
  0x1c   :  { %370 = vmatpush.msra.mxu1 %v104_v7  ;;  %123 = vmatpush.msra.mxu0 %v104_v7  ;;  %v77_v44 = vld [vmem:[#allocation2 + $0xf0] sm:$0xff]  ;;  %v78_v48 = vld [vmem:[#allocation2 + $0xf8] sm:$0xff]  ;;  %v55_v51 = vld [vmem:[#allocation2 + $0x40] sm:$0xff] }
  0x1d   :  { %374 = vmatpush.msra.mxu2 %v103_v8  ;;  %375 = vmatpush.msra.mxu3 %v103_v8  ;;  %v65_v46 = vld [vmem:[#allocation2 + $0x90] sm:$0xff]  ;;  %v66_v50 = vld [vmem:[#allocation2 + $0x98] sm:$0xff]  ;;  %v79_v52 = vld [vmem:[#allocation2 + $0x100] sm:$0xff] }
  0x1e   :  { %373 = vmatpush.msra.mxu1 %v103_v8  ;;  %124 = vmatpush.msra.mxu0 %v103_v8  ;;  %v92_v53 = vld [vmem:[#allocation2 + $0x168] sm:$0xff]  ;;  %v67_v54 = vld [vmem:[#allocation2 + $0xa0] sm:$0xff]  ;;  %v93_v57 = vld [vmem:[#allocation2 + $0x170] sm:$0xff] }
  0x1f   :  { %377 = vmatpush.msra.mxu2 %v102_v9  ;;  %378 = vmatpush.msra.mxu3 %v102_v9  ;;  %v56_v55 = vld [vmem:[#allocation2 + $0x48] sm:$0xff]  ;;  %v57_v59 = vld [vmem:[#allocation2 + $0x50] sm:$0xff]  ;;  %v94_v61 = vld [vmem:[#allocation2 + $0x178] sm:$0xff] }
  0x20   :  { %376 = vmatpush.msra.mxu1 %v102_v9  ;;  %125 = vmatpush.msra.mxu0 %v102_v9  ;;  %v80_v56 = vld [vmem:[#allocation2 + $0x108] sm:$0xff]  ;;  %v81_v60 = vld [vmem:[#allocation2 + $0x110] sm:$0xff]  ;;  %v82_v63 = vld [vmem:[#allocation2 + $0x118] sm:$0xff] }
  0x21   :  { %380 = vmatpush.msra.mxu2 %v101_v10  ;;  %381 = vmatpush.msra.mxu3 %v101_v10  ;;  %v68_v58 = vld [vmem:[#allocation2 + $0xa8] sm:$0xff]  ;;  %v69_v62 = vld [vmem:[#allocation2 + $0xb0] sm:$0xff]  ;;  %v95_v0 = vld [vmem:[#allocation2 + $0x180] sm:$0xff] }
  0x22   :  { %379 = vmatpush.msra.mxu1 %v101_v10  ;;  %126 = vmatpush.msra.mxu0 %v101_v10  ;;  %v521_v1 = vld [vmem:[%s580_s2] ss:$0 sm:$0xff]  ;;  %s485_s2 = smov [#allocation7]  }
  0x23   :  { %383 = vmatpush.msra.mxu2 %v100_v11  ;;  %384 = vmatpush.msra.mxu3 %v100_v11  ;;  %s333_s24 = sshll.u32 %s485_s2, 4  ;;  %s334_s24 = int_to_ptr.vmem [resolvable:$true] %s333_s24 }
  0x24   :  { %382 = vmatpush.msra.mxu1 %v100_v11  ;;  %127 = vmatpush.msra.mxu0 %v100_v11 }
  0x25   :  { %386 = vmatpush.msra.mxu2 %v99_v12  ;;  %387 = vmatpush.msra.mxu3 %v99_v12 }
  0x26   :  { %385 = vmatpush.msra.mxu1 %v99_v12  ;;  %128 = vmatpush.msra.mxu0 %v99_v12 }
  0x27   :  { %389 = vmatpush.msra.mxu2 %v98_v13  ;;  %390 = vmatpush.msra.mxu3 %v98_v13 }
  0x28   :  { %388 = vmatpush.msra.mxu1 %v98_v13  ;;  %129 = vmatpush.msra.mxu0 %v98_v13 }
  0x29   :  { %392 = vmatpush.msra.mxu2 %v97_v14  ;;  %393 = vmatpush.msra.mxu3 %v97_v14 }
  0x2a   :  { %391 = vmatpush.msra.mxu1 %v97_v14  ;;  %130 = vmatpush.msra.mxu0 %v97_v14 }
  0x2b   :  { %395 = vmatpush.msra.mxu2 %v96_v15  ;;  %396 = vmatpush.msra.mxu3 %v96_v15 }
  0x2c   :  { %201 = vmatmul.f32.vlgmr.msra.gmra.mxu2 %v70_v16  ;;  %240 = vmatmul.f32.vlgmr.msra.gmra.mxu3 %v83_v17 }
  0x2d   :  { %394 = vmatpush.msra.mxu1 %v96_v15  ;;  %131 = vmatpush.msra.mxu0 %v96_v15 }
  0x2e   :  { %165 = vmatmul.f32.vlgmr.msra.gmra.mxu1 %v58_v18  ;;  %132 = vmatmul.f32.vlgmr.msra.gmra.mxu0 %v47_v19 }
  0x34   :  { %204 = vmatmul.f32.gmra.mxu2 %v71_v20  ;;  %243 = vmatmul.f32.gmra.mxu3 %v84_v21 }
  0x36   :  { %168 = vmatmul.f32.gmra.mxu1 %v59_v22  ;;  %135 = vmatmul.f32.gmra.mxu0 %v48_v23 }
  0x3c   :  { %207 = vmatmul.f32.gmra.mxu2 %v72_v24  ;;  %246 = vmatmul.f32.gmra.mxu3 %v85_v25 }
  0x3e   :  { %171 = vmatmul.f32.gmra.mxu1 %v60_v26  ;;  %138 = vmatmul.f32.gmra.mxu0 %v49_v27 }
  0x44   :  { %210 = vmatmul.f32.gmra.mxu2 %v73_v28  ;;  %249 = vmatmul.f32.gmra.mxu3 %v86_v29 }
  0x46   :  { %174 = vmatmul.f32.gmra.mxu1 %v61_v30  ;;  %141 = vmatmul.f32.gmra.mxu0 %v50_v31 }
  0x4c   :  { %213 = vmatmul.f32.gmra.mxu2 %v74_v32  ;;  %252 = vmatmul.f32.gmra.mxu3 %v87_v33 }
  0x4e   :  { %177 = vmatmul.f32.gmra.mxu1 %v62_v34  ;;  %144 = vmatmul.f32.gmra.mxu0 %v51_v35 }
  0x54   :  { %216 = vmatmul.f32.gmra.mxu2 %v75_v36  ;;  %255 = vmatmul.f32.gmra.mxu3 %v88_v37 }
  0x56   :  { %180 = vmatmul.f32.gmra.mxu1 %v63_v38  ;;  %147 = vmatmul.f32.gmra.mxu0 %v52_v39 }
  0x5c   :  { %219 = vmatmul.f32.gmra.mxu2 %v76_v40  ;;  %258 = vmatmul.f32.gmra.mxu3 %v89_v41 }
  0x5e   :  { %183 = vmatmul.f32.gmra.mxu1 %v64_v42  ;;  %150 = vmatmul.f32.gmra.mxu0 %v53_v43 }
  0x64   :  { %222 = vmatmul.f32.gmra.mxu2 %v77_v44  ;;  %261 = vmatmul.f32.gmra.mxu3 %v90_v45 }
  0x66   :  { %186 = vmatmul.f32.gmra.mxu1 %v65_v46  ;;  %153 = vmatmul.f32.gmra.mxu0 %v54_v47 }
  0x6c   :  { %225 = vmatmul.f32.gmra.mxu2 %v78_v48  ;;  %264 = vmatmul.f32.gmra.mxu3 %v91_v49 }
  0x6e   :  { %189 = vmatmul.f32.gmra.mxu1 %v66_v50  ;;  %156 = vmatmul.f32.gmra.mxu0 %v55_v51 }
  0x74   :  { %228 = vmatmul.f32.gmra.mxu2 %v79_v52  ;;  %267 = vmatmul.f32.gmra.mxu3 %v92_v53 }
  0x76   :  { %192 = vmatmul.f32.gmra.mxu1 %v67_v54  ;;  %159 = vmatmul.f32.gmra.mxu0 %v56_v55 }
  0x7c   :  { %231 = vmatmul.f32.gmra.mxu2 %v80_v56  ;;  %270 = vmatmul.f32.gmra.mxu3 %v93_v57 }
  0x7e   :  { %195 = vmatmul.f32.gmra.mxu1 %v68_v58  ;;  %162 = vmatmul.f32.gmra.mxu0 %v57_v59 }
  0x84   :  { %234 = vmatmul.f32.gmra.mxu2 %v81_v60  ;;  %273 = vmatmul.f32.gmra.mxu3 %v94_v61 }
  0x86   :  { %198 = vmatmul.f32.gmra.mxu1 %v69_v62 }
  0x8c   :  { %237 = vmatmul.f32.gmra.mxu2 %v82_v63  ;;  %276 = vmatmul.f32.gmra.mxu3 %v95_v0 }
  0xab   :  { %v166_v2 = vpop.f32.mrf.mxu1  ;;  %v133_v3 = vpop.f32.mrf.mxu0 }
  0xac   :  { %v167_v4 = vadd.f32 %v521_v1, %v166_v2  ;;  %v134_v5 = vadd.f32 %v521_v1, %v133_v3 }
  0xae   :  { %291 = vst [vmem:[#allocation7 + $0x58] sm:$0xff] %v167_v4 }
  0xaf   :  { %v202_v6 = vpop.f32.mrf.mxu2  ;;  %v241_v7 = vpop.f32.mrf.mxu3  ;;  %280 = vst [vmem:[#allocation7] sm:$0xff] %v134_v5 }
  0xb0   :  { %v203_v8 = vadd.f32 %v521_v1, %v202_v6  ;;  %v242_v9 = vadd.f32 %v521_v1, %v241_v7 }
  0xb2   :  { %303 = vst [vmem:[#allocation7 + $0xb8] sm:$0xff] %v203_v8 }
  0xb3   :  { %316 = vst [vmem:[#allocation7 + $0x120] sm:$0xff] %v242_v9  ;;  %v169_v10 = vpop.f32.mrf.mxu1  ;;  %v136_v11 = vpop.f32.mrf.mxu0 }
  0xb4   :  { %v170_v12 = vadd.f32 %v521_v1, %v169_v10  ;;  %v137_v13 = vadd.f32 %v521_v1, %v136_v11 }
  0xb6   :  { %292 = vst [vmem:[#allocation7 + $0x60] sm:$0xff] %v170_v12 }
  0xb7   :  { %v205_v14 = vpop.f32.mrf.mxu2  ;;  %v244_v15 = vpop.f32.mrf.mxu3  ;;  %281 = vst [vmem:[#allocation7 + $0x8] sm:$0xff] %v137_v13 }
  0xb8   :  { %v206_v16 = vadd.f32 %v521_v1, %v205_v14  ;;  %v245_v17 = vadd.f32 %v521_v1, %v244_v15 }
  0xba   :  { %304 = vst [vmem:[#allocation7 + $0xc0] sm:$0xff] %v206_v16 }
  0xbb   :  { %317 = vst [vmem:[#allocation7 + $0x128] sm:$0xff] %v245_v17  ;;  %v172_v18 = vpop.f32.mrf.mxu1  ;;  %v139_v19 = vpop.f32.mrf.mxu0 }
  0xbc   :  { %v173_v20 = vadd.f32 %v521_v1, %v172_v18  ;;  %v140_v21 = vadd.f32 %v521_v1, %v139_v19 }
  0xbe   :  { %293 = vst [vmem:[#allocation7 + $0x68] sm:$0xff] %v173_v20 }
  0xbf   :  { %v208_v22 = vpop.f32.mrf.mxu2  ;;  %v247_v23 = vpop.f32.mrf.mxu3  ;;  %282 = vst [vmem:[#allocation7 + $0x10] sm:$0xff] %v140_v21 }
  0xc0   :  { %v209_v24 = vadd.f32 %v521_v1, %v208_v22  ;;  %v248_v25 = vadd.f32 %v521_v1, %v247_v23 }
  0xc2   :  { %305 = vst [vmem:[#allocation7 + $0xc8] sm:$0xff] %v209_v24 }
  0xc3   :  { %318 = vst [vmem:[#allocation7 + $0x130] sm:$0xff] %v248_v25  ;;  %v175_v26 = vpop.f32.mrf.mxu1  ;;  %v142_v27 = vpop.f32.mrf.mxu0 }
  0xc4   :  { %v176_v28 = vadd.f32 %v521_v1, %v175_v26  ;;  %v143_v29 = vadd.f32 %v521_v1, %v142_v27 }
  0xc6   :  { %294 = vst [vmem:[#allocation7 + $0x70] sm:$0xff] %v176_v28 }
  0xc7   :  { %v211_v30 = vpop.f32.mrf.mxu2  ;;  %v250_v31 = vpop.f32.mrf.mxu3  ;;  %283 = vst [vmem:[#allocation7 + $0x18] sm:$0xff] %v143_v29 }
  0xc8   :  { %v212_v32 = vadd.f32 %v521_v1, %v211_v30  ;;  %v251_v33 = vadd.f32 %v521_v1, %v250_v31 }
  0xca   :  { %306 = vst [vmem:[#allocation7 + $0xd0] sm:$0xff] %v212_v32 }
  0xcb   :  { %319 = vst [vmem:[#allocation7 + $0x138] sm:$0xff] %v251_v33  ;;  %v178_v34 = vpop.f32.mrf.mxu1  ;;  %v145_v35 = vpop.f32.mrf.mxu0 }
  0xcc   :  { %v179_v36 = vadd.f32 %v521_v1, %v178_v34  ;;  %v146_v37 = vadd.f32 %v521_v1, %v145_v35 }
  0xce   :  { %295 = vst [vmem:[#allocation7 + $0x78] sm:$0xff] %v179_v36 }
  0xcf   :  { %v214_v38 = vpop.f32.mrf.mxu2  ;;  %v253_v39 = vpop.f32.mrf.mxu3  ;;  %284 = vst [vmem:[#allocation7 + $0x20] sm:$0xff] %v146_v37 }
  0xd0   :  { %v215_v40 = vadd.f32 %v521_v1, %v214_v38  ;;  %v254_v41 = vadd.f32 %v521_v1, %v253_v39 }
  0xd2   :  { %307 = vst [vmem:[#allocation7 + $0xd8] sm:$0xff] %v215_v40 }
  0xd3   :  { %320 = vst [vmem:[#allocation7 + $0x140] sm:$0xff] %v254_v41  ;;  %v181_v42 = vpop.f32.mrf.mxu1  ;;  %v148_v43 = vpop.f32.mrf.mxu0 }
  0xd4   :  { %v182_v44 = vadd.f32 %v521_v1, %v181_v42  ;;  %v149_v45 = vadd.f32 %v521_v1, %v148_v43 }
  0xd6   :  { %296 = vst [vmem:[#allocation7 + $0x80] sm:$0xff] %v182_v44 }
  0xd7   :  { %v217_v46 = vpop.f32.mrf.mxu2  ;;  %v256_v47 = vpop.f32.mrf.mxu3  ;;  %285 = vst [vmem:[#allocation7 + $0x28] sm:$0xff] %v149_v45 }
  0xd8   :  { %v218_v48 = vadd.f32 %v521_v1, %v217_v46  ;;  %v257_v49 = vadd.f32 %v521_v1, %v256_v47 }
  0xda   :  { %308 = vst [vmem:[#allocation7 + $0xe0] sm:$0xff] %v218_v48 }
  0xdb   :  { %321 = vst [vmem:[#allocation7 + $0x148] sm:$0xff] %v257_v49  ;;  %v184_v50 = vpop.f32.mrf.mxu1  ;;  %v151_v51 = vpop.f32.mrf.mxu0 }
  0xdc   :  { %v185_v52 = vadd.f32 %v521_v1, %v184_v50  ;;  %v152_v53 = vadd.f32 %v521_v1, %v151_v51 }
  0xde   :  { %297 = vst [vmem:[#allocation7 + $0x88] sm:$0xff] %v185_v52 }
  0xdf   :  { %v220_v54 = vpop.f32.mrf.mxu2  ;;  %v259_v55 = vpop.f32.mrf.mxu3  ;;  %286 = vst [vmem:[#allocation7 + $0x30] sm:$0xff] %v152_v53 }
  0xe0   :  { %v221_v56 = vadd.f32 %v521_v1, %v220_v54  ;;  %v260_v57 = vadd.f32 %v521_v1, %v259_v55 }
  0xe2   :  { %309 = vst [vmem:[#allocation7 + $0xe8] sm:$0xff] %v221_v56 }
  0xe3   :  { %322 = vst [vmem:[#allocation7 + $0x150] sm:$0xff] %v260_v57  ;;  %v187_v58 = vpop.f32.mrf.mxu1  ;;  %v154_v59 = vpop.f32.mrf.mxu0 }
  0xe4   :  { %v188_v60 = vadd.f32 %v521_v1, %v187_v58  ;;  %v155_v61 = vadd.f32 %v521_v1, %v154_v59 }
  0xe6   :  { %298 = vst [vmem:[#allocation7 + $0x90] sm:$0xff] %v188_v60 }
  0xe7   :  { %v223_v62 = vpop.f32.mrf.mxu2  ;;  %v262_v63 = vpop.f32.mrf.mxu3  ;;  %287 = vst [vmem:[#allocation7 + $0x38] sm:$0xff] %v155_v61 }
  0xe8   :  { %v224_v0 = vadd.f32 %v521_v1, %v223_v62  ;;  %v263_v2 = vadd.f32 %v521_v1, %v262_v63 }
  0xea   :  { %310 = vst [vmem:[#allocation7 + $0xf0] sm:$0xff] %v224_v0 }
  0xeb   :  { %323 = vst [vmem:[#allocation7 + $0x158] sm:$0xff] %v263_v2  ;;  %v190_v3 = vpop.f32.mrf.mxu1  ;;  %v157_v4 = vpop.f32.mrf.mxu0 }
  0xec   :  { %v191_v5 = vadd.f32 %v521_v1, %v190_v3  ;;  %v158_v6 = vadd.f32 %v521_v1, %v157_v4 }
  0xee   :  { %299 = vst [vmem:[#allocation7 + $0x98] sm:$0xff] %v191_v5 }
  0xef   :  { %v226_v7 = vpop.f32.mrf.mxu2  ;;  %v265_v8 = vpop.f32.mrf.mxu3  ;;  %288 = vst [vmem:[#allocation7 + $0x40] sm:$0xff] %v158_v6 }
  0xf0   :  { %v227_v9 = vadd.f32 %v521_v1, %v226_v7  ;;  %v266_v10 = vadd.f32 %v521_v1, %v265_v8 }
  0xf2   :  { %311 = vst [vmem:[#allocation7 + $0xf8] sm:$0xff] %v227_v9 }
  0xf3   :  { %324 = vst [vmem:[#allocation7 + $0x160] sm:$0xff] %v266_v10  ;;  %v193_v11 = vpop.f32.mrf.mxu1  ;;  %v160_v12 = vpop.f32.mrf.mxu0 }
  0xf4   :  { %v194_v13 = vadd.f32 %v521_v1, %v193_v11  ;;  %v161_v14 = vadd.f32 %v521_v1, %v160_v12 }
  0xf6   :  { %300 = vst [vmem:[#allocation7 + $0xa0] sm:$0xff] %v194_v13 }
  0xf7   :  { %v229_v15 = vpop.f32.mrf.mxu2  ;;  %v268_v16 = vpop.f32.mrf.mxu3  ;;  %289 = vst [vmem:[#allocation7 + $0x48] sm:$0xff] %v161_v14 }
  0xf8   :  { %v230_v17 = vadd.f32 %v521_v1, %v229_v15  ;;  %v269_v18 = vadd.f32 %v521_v1, %v268_v16 }
  0xfa   :  { %312 = vst [vmem:[#allocation7 + $0x100] sm:$0xff] %v230_v17 }
  0xfb   :  { %325 = vst [vmem:[#allocation7 + $0x168] sm:$0xff] %v269_v18  ;;  %v196_v19 = vpop.f32.mrf.mxu1  ;;  %v163_v20 = vpop.f32.mrf.mxu0 }
  0xfc   :  { %v197_v21 = vadd.f32 %v521_v1, %v196_v19  ;;  %v164_v22 = vadd.f32 %v521_v1, %v163_v20 }
  0xfe   :  { %301 = vst [vmem:[#allocation7 + $0xa8] sm:$0xff] %v197_v21 }
  0xff   :  { %v232_v23 = vpop.f32.mrf.mxu2  ;;  %v271_v24 = vpop.f32.mrf.mxu3  ;;  %290 = vst [vmem:[#allocation7 + $0x50] sm:$0xff] %v164_v22 }
 0x100   :  { %v233_v25 = vadd.f32 %v521_v1, %v232_v23  ;;  %v272_v26 = vadd.f32 %v521_v1, %v271_v24 }
 0x102   :  { %313 = vst [vmem:[#allocation7 + $0x108] sm:$0xff] %v233_v25 }
 0x103   :  { %326 = vst [vmem:[#allocation7 + $0x170] sm:$0xff] %v272_v26  ;;  %v199_v27 = vpop.f32.mrf.mxu1 }
 0x104   :  { %v200_v28 = vadd.f32 %v521_v1, %v199_v27 }
 0x106   :  { %302 = vst [vmem:[#allocation7 + $0xb0] sm:$0xff] %v200_v28 }
 0x107   :  { %v235_v29 = vpop.f32.mrf.mxu2  ;;  %v274_v30 = vpop.f32.mrf.mxu3 }
 0x108   :  { %v236_v31 = vadd.f32 %v521_v1, %v235_v29  ;;  %v275_v32 = vadd.f32 %v521_v1, %v274_v30 }
 0x10a   :  { %314 = vst [vmem:[#allocation7 + $0x110] sm:$0xff] %v236_v31 }
 0x10b   :  { %327 = vst [vmem:[#allocation7 + $0x178] sm:$0xff] %v275_v32 }
 0x10f   :  { %v238_v33 = vpop.f32.mrf.mxu2  ;;  %v277_v34 = vpop.f32.mrf.mxu3 }
 0x110   :  { %v239_v35 = vadd.f32 %v521_v1, %v238_v33  ;;  %v278_v36 = vadd.f32 %v521_v1, %v277_v34 }
 0x112   :  { %315 = vst [vmem:[#allocation7 + $0x118] sm:$0xff] %v239_v35 }
 0x113   :  { %328 = vst [vmem:[#allocation7 + $0x180] sm:$0xff] %v278_v36 }
 0x114   :  { %341 = dma.vmem_to_hbm [thread:$0]  %s334_s24, 6272, %s336_s27, [#allocation4], %s482_s20, %s482_s20, %s483_s21  }
 0x115   :  { %479 = dma.done.wait [#allocation4], 6272  }
 0x116   :  { %480 = vsyncadd [#allocation4], 4294961024 }
 0x117   :  { %346 = vsyncpa [#allocation3], 1 }
 0x118   :  { %347 = vsyncpa [#allocation6], 1 }
 0x119   :  { %348 = vsyncpa [#allocation4], 1 }

</bundles_post_ra>
